<compile_context>
chip_gen: v7x
topology: tpu7x:2x2x1
jax: 0.10.0
libtpu: 0.0.40
codegen_flags: <defaults>
</compile_context>

<pallas_src>
import jax
import jax.numpy as jnp
from jax.experimental import pallas as pl
from jax.experimental.pallas import tpu as pltpu

_LANES = 128
_TILE_ROWS = 2048                 # (2048, 128) f32 = 1 MiB per block
_SMALL_LIMIT_BYTES = 512 * 1024   # <= 512 KiB -> single VMEM-resident block


def _relu_kernel(x_ref, o_ref):
    # Single VPU elementwise max over the VMEM-resident block.
    o_ref[...] = jnp.maximum(x_ref[...], jnp.zeros((), dtype=x_ref.dtype))


def _relu_single_block(x2d: jax.Array) -> jax.Array:
    # Whole slab resident in VMEM; no grid loop / pipeline prologue.
    return pl.pallas_call(
        _relu_kernel,
        out_shape=jax.ShapeDtypeStruct(x2d.shape, x2d.dtype),
        in_specs=[pl.BlockSpec(memory_space=pltpu.MemorySpace.VMEM)],
        out_specs=pl.BlockSpec(memory_space=pltpu.MemorySpace.VMEM),
    )(x2d)


def _relu_tiled(x2d: jax.Array) -> jax.Array:
    # Row-tiled streaming path for large activations (HBM-bandwidth bound).
    # cdiv grid: a partial last block is masked by Pallas, so no wrapper pad.
    rows, lanes = x2d.shape
    return pl.pallas_call(
        _relu_kernel,
        out_shape=jax.ShapeDtypeStruct(x2d.shape, x2d.dtype),
        grid=(pl.cdiv(rows, _TILE_ROWS),),
        in_specs=[pl.BlockSpec((_TILE_ROWS, lanes), lambda i: (i, 0))],
        out_specs=pl.BlockSpec((_TILE_ROWS, lanes), lambda i: (i, 0)),
        compiler_params=pltpu.CompilerParams(
            dimension_semantics=("parallel",)
        ),
    )(x2d)


@jax.jit
def pallas_relu(x: jax.Array) -> jax.Array:
    """ReLU over a tensor; matches torch.nn.ReLU(inplace=True) forward."""
    orig_shape = x.shape
    n_elem = x.size
    nbytes = n_elem * x.dtype.itemsize

    # --- Small / dispatch-bound case (the module's 1x96x7x7 input lands here).
    if nbytes <= _SMALL_LIMIT_BYTES:
        if x.ndim >= 2:
            lead = 1
            for d in x.shape[:-2]:
                lead *= d
            # Merge the trailing two dims for a wider lane dim: (1,96,7,7)->(96,49).
            x2d = x.reshape(lead, x.shape[-2] * x.shape[-1])
        else:
            x2d = x.reshape(1, n_elem)
        return _relu_single_block(x2d).reshape(orig_shape)

    # --- Large / HBM-bound case.
    if n_elem % _LANES == 0:
        # Common case for conv activations: lane-dense (rows, 128) view with
        # no padded copy and no tail slice.
        x2d = x.reshape(n_elem // _LANES, _LANES)
        return _relu_tiled(x2d).reshape(orig_shape)

    # Rare ragged large case: pad once, run tiled, strip (relu(0) == 0).
    # TODO(synk): handle the ragged tail with an in-kernel masked store instead
    # of the wrapper-side pad+slice to avoid the extra HBM pass.
    padded = pl.cdiv(n_elem, _LANES) * _LANES
    flat = jnp.pad(x.reshape(-1), (0, padded - n_elem))
    out2d = _relu_tiled(flat.reshape(padded // _LANES, _LANES))
    return out2d.reshape(-1)[:n_elem].reshape(orig_shape)


if __name__ == "__main__":
    key = jax.random.PRNGKey(0)

    # Module forward input shape: [1, 96, 7, 7], NCHW, f32 -> small path.
    x = jax.random.normal(key, (1, 96, 7, 7), dtype=jnp.float32)
    y = pallas_relu(x)
    jax.block_until_ready(y)
    y_ref = jnp.maximum(x, 0.0)
    assert y.shape == x.shape and y.dtype == x.dtype
    assert bool(jnp.all(y == y_ref))

    # Also exercise the tiled (large) path, including a partial last block.
    key2 = jax.random.PRNGKey(0)
    xl = jax.random.normal(key2, (1, 96, 56, 56), dtype=jnp.float32)  # ~1.15 MiB
    yl = pallas_relu(xl)
    jax.block_until_ready(yl)
    assert bool(jnp.all(yl == jnp.maximum(xl, 0.0)))

    print("KERNEL_OK")
</pallas_src>

<mosaic_0001>
module attributes {stable_mosaic.version = 11 : i64} {
  func.func @_relu_kernel(%arg0: memref<96x49xf32, #tpu.memory_space<vmem>>, %arg1: memref<96x49xf32, #tpu.memory_space<vmem>>) attributes {dimension_semantics = [], scalar_prefetch = 0 : i64, scratch_operands = 0 : i64, tpu.core_type = #tpu.core_type<tc>} {
    %c0 = arith.constant 0 : index
    %c0_0 = arith.constant 0 : index
    %0 = vector.load %arg0[%c0, %c0_0] : memref<96x49xf32, #tpu.memory_space<vmem>>, vector<96x49xf32>
    %cst = arith.constant 0.000000e+00 : f32
    %1 = vector.broadcast %cst : f32 to vector<96x49xf32>
    %2 = arith.maximumf %0, %1 : vector<96x49xf32>
    %c0_1 = arith.constant 0 : index
    %c0_2 = arith.constant 0 : index
    %3 = vector.load %arg1[%c0_1, %c0_2] : memref<96x49xf32, #tpu.memory_space<vmem>>, vector<96x49xf32>
    tpu.vector_store %arg1[%c0_1, %c0_2], %2 {strides = array<i32>} : memref<96x49xf32, #tpu.memory_space<vmem>>, vector<96x49xf32>,
    return
  }
}

</mosaic_0001>

<bundles_post_ra>
// kernel: pallas_relu.1
= control target key start
LH: loop header
LB: loop body
LE: loop exit
PB: predicated region body
PF: predicated region fallthrough
CT: control target
= control target key end

     0   :  { %vm32_vm0 = vcmask 400384   ;;  %s143_s0 = inlined_call_operand.vmem [shape: f32[96,49], index: 0, kind: input, shape index: {}]   ;;  %s144_s1 = inlined_call_operand.vmem [shape: f32[96,49], index: 1, kind: output, shape index: {}]  }
   0x1   :  { %v8_v0 = vld [vmem:[%s143_s0] sm:$0xff]  ;;  %v9_v1 = vld [vmem:[%s143_s0 + $0x8] sm:$0xff]  ;;  %v10_v2 = vld [vmem:[%s143_s0 + $0x10] sm:$0xff] }
   0x2   :  { %v20_v3 = vmax.f32 %v8_v0, 0.0  ;;  %v21_v4 = vmax.f32 %v9_v1, 0.0  ;;  %v22_v5 = vmax.f32 %v10_v2, 0.0  ;;  %v11_v6 = vld [vmem:[%s143_s0 + $0x18] sm:$0xff]  ;;  %v12_v7 = vld [vmem:[%s143_s0 + $0x20] sm:$0xff]  ;;  %v13_v8 = vld [vmem:[%s143_s0 + $0x28] sm:$0xff] }
   0x3   :  { %v23_v9 = vmax.f32 %v11_v6, 0.0  ;;  %v24_v10 = vmax.f32 %v12_v7, 0.0  ;;  %v25_v11 = vmax.f32 %v13_v8, 0.0  ;;  %v14_v12 = vld [vmem:[%s143_s0 + $0x30] sm:$0xff]  ;;  %v15_v13 = vld [vmem:[%s143_s0 + $0x38] sm:$0xff]  ;;  %v16_v14 = vld [vmem:[%s143_s0 + $0x40] sm:$0xff] }
   0x4   :  { %33 = vst.msk [vmem:[%s144_s1] sm:$0xff] %vm32_vm0, %v20_v3  ;;  %34 = vst.msk [vmem:[%s144_s1 + $0x8] sm:$0xff] %vm32_vm0, %v21_v4  ;;  %v26_v15 = vmax.f32 %v14_v12, 0.0  ;;  %v27_v16 = vmax.f32 %v15_v13, 0.0  ;;  %v28_v17 = vmax.f32 %v16_v14, 0.0  ;;  %v17_v18 = vld [vmem:[%s143_s0 + $0x48] sm:$0xff] }
   0x5   :  { %35 = vst.msk [vmem:[%s144_s1 + $0x10] sm:$0xff] %vm32_vm0, %v22_v5  ;;  %v18_v19 = vld [vmem:[%s143_s0 + $0x50] sm:$0xff]  ;;  %v19_v20 = vld [vmem:[%s143_s0 + $0x58] sm:$0xff]  ;;  %36 = vst.msk [vmem:[%s144_s1 + $0x18] sm:$0xff] %vm32_vm0, %v23_v9  ;;  %v29_v21 = vmax.f32 %v17_v18, 0.0 }
   0x6   :  { %37 = vst.msk [vmem:[%s144_s1 + $0x20] sm:$0xff] %vm32_vm0, %v24_v10  ;;  %38 = vst.msk [vmem:[%s144_s1 + $0x28] sm:$0xff] %vm32_vm0, %v25_v11  ;;  %v30_v22 = vmax.f32 %v18_v19, 0.0  ;;  %v31_v23 = vmax.f32 %v19_v20, 0.0 }
   0x7   :  { %39 = vst.msk [vmem:[%s144_s1 + $0x30] sm:$0xff] %vm32_vm0, %v26_v15  ;;  %40 = vst.msk [vmem:[%s144_s1 + $0x38] sm:$0xff] %vm32_vm0, %v27_v16 }
   0x8   :  { %41 = vst.msk [vmem:[%s144_s1 + $0x40] sm:$0xff] %vm32_vm0, %v28_v17  ;;  %42 = vst.msk [vmem:[%s144_s1 + $0x48] sm:$0xff] %vm32_vm0, %v29_v21 }
   0x9   :  { %43 = vst.msk [vmem:[%s144_s1 + $0x50] sm:$0xff] %vm32_vm0, %v30_v22  ;;  %44 = vst.msk [vmem:[%s144_s1 + $0x58] sm:$0xff] %vm32_vm0, %v31_v23 }

</bundles_post_ra>
